<compile_context>
chip_gen: v7x
topology: tpu7x:2x2x1
jax: 0.10.0
libtpu: 0.0.40
codegen_flags: <defaults>
</compile_context>

<pallas_src>
import functools

import jax
import jax.numpy as jnp
from jax.experimental import pallas as pl
from jax.experimental.pallas import tpu as pltpu


def _avg_readout_kernel(seq_ref, out_ref, *scratch, n_total, tn, inv_n):
    """seq_ref: (bb, tn, th) tile; out_ref: (bb, th); scratch[0]: (bb, th) f32 (optional)."""
    use_scratch = len(scratch) > 0
    acc_ref = scratch[0] if use_scratch else out_ref  # f32 either way

    j = pl.program_id(2)                 # N-tile index (reduction axis, trailing/'arbitrary')
    last = pl.num_programs(2) - 1

    @pl.when(j == 0)
    def _():
        acc_ref[...] = jnp.zeros_like(acc_ref)

    ragged = (n_total % tn) != 0
    if ragged:
        # Unmasked fast path on all tiles except the last (partial) one.
        @pl.when(j != last)
        def _():
            acc_ref[...] += jnp.sum(seq_ref[...].astype(jnp.float32), axis=1)

        @pl.when(j == last)
        def _():
            x = seq_ref[...].astype(jnp.float32)
            row = jax.lax.broadcasted_iota(jnp.int32, x.shape, 1)
            x = jnp.where(j * tn + row < n_total, x, 0.0)
            acc_ref[...] += jnp.sum(x, axis=1)
    else:
        acc_ref[...] += jnp.sum(seq_ref[...].astype(jnp.float32), axis=1)

    @pl.when(j == last)
    def _():
        if use_scratch:
            out_ref[...] = (acc_ref[...] * inv_n).astype(out_ref.dtype)
        else:
            out_ref[...] = acc_ref[...] * inv_n


def _chip_tuning():
    """Returns (input tile budget bytes, vmem_limit_bytes) per TPU generation."""
    kind = ""
    try:
        kind = jax.devices()[0].device_kind.lower()
    except Exception:
        pass
    if "v7" in kind:
        # 3.2 TB/s HBM: bigger tiles amortize the ~0.35 us/step overhead; stay
        # well under the 64 MiB physical VMEM with 2x double-buffered inputs.
        return 14 * 1024 * 1024, 48 * 1024 * 1024
    if "v5" in kind or "v6" in kind or "v4" in kind:
        return 8 * 1024 * 1024, 64 * 1024 * 1024
    return 8 * 1024 * 1024, 48 * 1024 * 1024  # unknown chip: conservative limit


def avg_readout(seq, *, tn=None, tile_budget_bytes=None):
    """Mean over axis 1 of a (B, N, H) array, computed in a Pallas TPU kernel."""
    B, N, H = seq.shape
    if N == 0:
        raise ValueError("avg_readout requires N > 0")
    orig_dtype = seq.dtype
    inv_n = 1.0 / N

    # --- lane folding for small H: (B, N, H) -> (B, N/k, k*H), k = 128 // H ---
    fold_k = 1
    if H < 128:
        for k in range(max(1, 128 // H), 1, -1):
            if N % k == 0:
                fold_k = k
                break
        if fold_k > 1:
            seq = seq.reshape(B, N // fold_k, fold_k * H)

    _, Nk, Hk = seq.shape
    itemsize = jnp.dtype(seq.dtype).itemsize
    sublane = max(8, 32 // itemsize)          # 8 f32, 16 bf16, 32 int8/fp8

    # --- batch blocking: sublane-dense output rows, no padding (edge blocks) ---
    bb = sublane if B >= sublane else B
    b_blocks = pl.cdiv(B, bb)

    # --- H blocking: give the second v7x TensorCore work when batch is tiny ---
    th = Hk
    if b_blocks == 1 and Hk >= 256 and Hk % 128 == 0:
        th = Hk // 2 if (Hk // 2) % 128 == 0 else 128
    h_blocks = pl.cdiv(Hk, th)

    default_budget, vmem_limit = _chip_tuning()
    if tile_budget_bytes is None:
        tile_budget_bytes = default_budget

    # --- N tiling: size the input tile for the HBM roofline, keep VMEM bounded ---
    if tn is None:
        tn = tile_budget_bytes // max(1, bb * th * itemsize)
    tn = int(tn)
    if tn < Nk:
        # second-to-last block dim must be a multiple of 8 unless it spans all of N;
        # round to the dtype's packed-sublane multiple for full tiles.
        tn = max(sublane, (tn // sublane) * sublane)
    tn = min(tn, Nk)
    n_steps = pl.cdiv(Nk, tn)

    use_scratch = seq.dtype != jnp.float32
    scratch_shapes = [pltpu.VMEM((bb, th), jnp.float32)] if use_scratch else []

    kernel = functools.partial(_avg_readout_kernel, n_total=Nk, tn=tn, inv_n=inv_n)

    out = pl.pallas_call(
        kernel,
        out_shape=jax.ShapeDtypeStruct((B, Hk), seq.dtype),
        grid_spec=pltpu.PrefetchScalarGridSpec(
            num_scalar_prefetch=0,
            grid=(b_blocks, h_blocks, n_steps),
            in_specs=[pl.BlockSpec((bb, tn, th), lambda i, h, j: (i, j, h))],
            out_specs=pl.BlockSpec((bb, th), lambda i, h, j: (i, h)),
            scratch_shapes=scratch_shapes,
        ),
        compiler_params=pltpu.CompilerParams(
            dimension_semantics=("parallel", "parallel", "arbitrary"),
            vmem_limit_bytes=vmem_limit,
        ),
    )(seq)

    if fold_k > 1:
        # k-way fold of the tiny (B, k*H) partial means -> (B, H) total mean.
        out = (
            out.reshape(B, fold_k, H)
            .astype(jnp.float32)
            .sum(axis=1)
            .astype(orig_dtype)
        )
    return out


if __name__ == "__main__":
    key = jax.random.PRNGKey(0)
    k1, k2, k3, k4, k5 = jax.random.split(key, 5)

    # 1) Small shape matching the module's readout usage (batch, nodes, hidden=32).
    #    Exercises the small-H lane-folding path (k = 4 -> lane-dense 128-wide tiles).
    seq1 = jax.random.normal(k1, (2, 8, 32), dtype=jnp.float32)
    out1 = jax.block_until_ready(avg_readout(seq1))
    ref1 = jnp.mean(seq1, axis=1)
    assert out1.shape == (2, 32)
    assert jnp.allclose(out1, ref1, atol=1e-5, rtol=1e-5)

    # 2) Tiled reduction with a ragged last N-tile (N=200, tn=64): last-tile-only mask.
    seq2 = jax.random.normal(k2, (4, 200, 128), dtype=jnp.float32)
    out2 = jax.block_until_ready(avg_readout(seq2, tn=64))
    ref2 = jnp.mean(seq2, axis=1)
    assert jnp.allclose(out2, ref2, atol=1e-5, rtol=1e-5)

    # 3) bf16 input with f32 scratch accumulation (no batch pad, bb = full B).
    seq3 = jax.random.normal(k3, (10, 64, 128), dtype=jnp.bfloat16)
    out3 = jax.block_until_ready(avg_readout(seq3))
    ref3 = jnp.mean(seq3.astype(jnp.float32), axis=1)
    assert out3.shape == (10, 128)
    assert jnp.allclose(out3.astype(jnp.float32), ref3, atol=3e-2, rtol=3e-2)

    # 4) f32 with a ragged batch edge block (B=10, bb=8, grid cdiv -> partial block),
    #    accumulating directly into the output block (no scratch, no pad copy).
    seq4 = jax.random.normal(k4, (10, 64, 128), dtype=jnp.float32)
    out4 = jax.block_until_ready(avg_readout(seq4))
    ref4 = jnp.mean(seq4, axis=1)
    assert out4.shape == (10, 128)
    assert jnp.allclose(out4, ref4, atol=1e-5, rtol=1e-5)

    # 5) Small batch + large H: exercises the H-parallel grid axis (two 128-lane blocks).
    seq5 = jax.random.normal(k5, (2, 64, 256), dtype=jnp.float32)
    out5 = jax.block_until_ready(avg_readout(seq5))
    ref5 = jnp.mean(seq5, axis=1)
    assert out5.shape == (2, 256)
    assert jnp.allclose(out5, ref5, atol=1e-5, rtol=1e-5)

    # TODO(synk): the rest of Model.forward (MLP generator/discriminator, bilinear
    # discriminator, edge-list construction from the adjacency, and the BCE/recon
    # losses) is host/XLA-level graph logic and is not part of this readout kernel.
    print("KERNEL_OK")
</pallas_src>

<mosaic_0001>
module attributes {stable_mosaic.version = 11 : i64} {
  func.func @_avg_readout_kernel(%arg0: i32, %arg1: i32, %arg2: i32, %arg3: memref<2x2x128xf32, #tpu.memory_space<vmem>>, %arg4: memref<2x128xf32, #tpu.memory_space<vmem>>) attributes {dimension_semantics = [#tpu.dimension_semantics<parallel>, #tpu.dimension_semantics<parallel>, #tpu.dimension_semantics<arbitrary>], iteration_bounds = array<i64: 1, 1, 1>, scalar_prefetch = 0 : i64, scratch_operands = 0 : i64, tpu.core_type = #tpu.core_type<tc>, window_params = [{transform_indices = @transform_0, window_bounds = array<i64: 2, 2, 128>}, {transform_indices = @transform_1, window_bounds = array<i64: 2, 128>}]} {
    %c0_i32 = arith.constant 0 : i32
    %0 = arith.cmpi eq, %arg2, %c0_i32 : i32
    %1 = arith.extui %0 : i1 to i32
    %c0_i32_0 = arith.constant 0 : i32
    %2 = arith.cmpi ne, %1, %c0_i32_0 : i32
    scf.if %2 {
      %cst_9 = arith.constant 0.000000e+00 : f32
      %11 = vector.broadcast %cst_9 : f32 to vector<2x128xf32>
      %c0_10 = arith.constant 0 : index
      %c0_11 = arith.constant 0 : index
      %12 = vector.load %arg4[%c0_10, %c0_11] : memref<2x128xf32, #tpu.memory_space<vmem>>, vector<2x128xf32>
      tpu.vector_store %arg4[%c0_10, %c0_11], %11 {strides = array<i32>} : memref<2x128xf32, #tpu.memory_space<vmem>>, vector<2x128xf32>,
    } else {
    }
    %c0 = arith.constant 0 : index
    %c0_1 = arith.constant 0 : index
    %3 = vector.load %arg4[%c0, %c0_1] : memref<2x128xf32, #tpu.memory_space<vmem>>, vector<2x128xf32>
    %c0_2 = arith.constant 0 : index
    %c0_3 = arith.constant 0 : index
    %c0_4 = arith.constant 0 : index
    %4 = vector.load %arg3[%c0_2, %c0_3, %c0_4] : memref<2x2x128xf32, #tpu.memory_space<vmem>>, vector<2x2x128xf32>
    %cst = arith.constant dense<0.000000e+00> : vector<2x128xf32>
    %5 = vector.multi_reduction <add>, %4, %cst [1] : vector<2x2x128xf32> to vector<2x128xf32>
    %6 = arith.addf %3, %5 : vector<2x128xf32>
    %c0_5 = arith.constant 0 : index
    %c0_6 = arith.constant 0 : index
    %7 = vector.load %arg4[%c0_5, %c0_6] : memref<2x128xf32, #tpu.memory_space<vmem>>, vector<2x128xf32>
    tpu.vector_store %arg4[%c0_5, %c0_6], %6 {strides = array<i32>} : memref<2x128xf32, #tpu.memory_space<vmem>>, vector<2x128xf32>,
    %c0_i32_7 = arith.constant 0 : i32
    %8 = arith.cmpi eq, %arg2, %c0_i32_7 : i32
    %9 = arith.extui %8 : i1 to i32
    %c0_i32_8 = arith.constant 0 : i32
    %10 = arith.cmpi ne, %9, %c0_i32_8 : i32
    scf.if %10 {
      %c0_9 = arith.constant 0 : index
      %c0_10 = arith.constant 0 : index
      %11 = vector.load %arg4[%c0_9, %c0_10] : memref<2x128xf32, #tpu.memory_space<vmem>>, vector<2x128xf32>
      %cst_11 = arith.constant 1.250000e-01 : f32
      %12 = vector.broadcast %cst_11 : f32 to vector<2x128xf32>
      %13 = arith.mulf %11, %12 : vector<2x128xf32>
      %c0_12 = arith.constant 0 : index
      %c0_13 = arith.constant 0 : index
      %14 = vector.load %arg4[%c0_12, %c0_13] : memref<2x128xf32, #tpu.memory_space<vmem>>, vector<2x128xf32>
      tpu.vector_store %arg4[%c0_12, %c0_13], %13 {strides = array<i32>} : memref<2x128xf32, #tpu.memory_space<vmem>>, vector<2x128xf32>,
    } else {
    }
    return
  }
  func.func @transform_0(%arg0: i32, %arg1: i32, %arg2: i32) -> (i32, i32, i32) {
    %c0_i32 = arith.constant 0 : i32
    return %arg0, %arg2, %arg1 : i32, i32, i32
  }
  func.func @transform_1(%arg0: i32, %arg1: i32, %arg2: i32) -> (i32, i32) {
    %c0_i32 = arith.constant 0 : i32
    return %arg0, %arg1 : i32, i32
  }
}

</mosaic_0001>

<bundles_post_ra>
// kernel: tpu_custom_call.1
= control target key start
LH: loop header
LB: loop body
LE: loop exit
PB: predicated region body
PF: predicated region fallthrough
CT: control target
= control target key end

     0   :  { %6 = vsyncpa [#allocation3], 0  ;;  %s166_s0 = inlined_call_operand.hbm [shape: f32[2,2,128], index: 0, kind: input, shape index: {}]   ;;  %s167_s1 = inlined_call_operand.hbm [shape: f32[2,128], index: 1, kind: output, shape index: {}]  }
   0x1   :  { %7 = vsyncpa [#allocation4], 0  ;;  %s127_s6 = smov [#allocation2]   ;;  %s79_s10 = scalar_lea.hbm %s166_s0, 64 }
   0x2   :  { %s13_s7 = sshll.u32 %s127_s6, 4  ;;  %p80_p0 = scmp.ne.s32.totalorder %s166_s0, %s79_s10  ;;  %s14_s7 = int_to_ptr.vmem [resolvable:$true] %s13_s7 }
   0x3   :  { %p83_p1 = scmp.lt.u32.totalorder %s79_s10, %s166_s0 }
   0x5   :  { %p85_p2 = pnand %p83_p1, %p80_p0 }
   0x7   :  { %88 = shalt.err (!%p85_p2)
}
   0x8   :  { %s89_s15 = scalar_lea.vmem %s14_s7, 64  ;;  %p94_p4 = scmp.lt.s32.totalorder %s14_s7, %s14_s7 }
   0x9   :  { %p90_p3 = scmp.ne.s32.totalorder %s14_s7, %s89_s15  ;;  %p95_p5 = scmp.lt.s32.totalorder %s89_s15, %s89_s15 }
   0xb   :  { %p96_p6 = por %p95_p5, %p94_p4 }
   0xd   :  { %p97_p7 = pnand %p96_p6, %p90_p3 }
   0xf   :  { %100 = shalt.err (!%p97_p7)
}
  0x10   :  { %s128_s16 = smov 32   ;;  %s129_s17 = smov 2  }
  0x11   :  { %19 = dma.hbm_to_vmem [thread:$0]  %s166_s0, 64, %s14_s7, [#allocation3], %s128_s16, %s128_s16, %s129_s17  }
  0x12   :  { %123 = dma.done.wait [#allocation3], 64  }
  0x13   :  { %124 = vsyncadd [#allocation3], 4294967232  ;;  %v130_v0 = vmov 0.0   ;;  %vm31_vm0 = vcmask 1041408   ;;  %v29_v1 = vld [vmem:[#allocation2] sm:$0x3] }
  0x14   :  { %27 = vst [vmem:[#allocation5] sm:$0x3] %v130_v0  ;;  %v30_v2 = vld [vmem:[#allocation2 + $0x2] sm:$0x3]  ;;  %v32_v3 = vsel %vm31_vm0, %v29_v1, 0.0  ;;  %vm48_vm1 = vcmask 1041409  }
  0x15   :  { %v39_v4 = vsel %vm31_vm0, %v30_v2, 0.0  ;;  %v33_v5 = vrot.slane %v32_v3, 4  ;;  %s131_s0 = smov [#allocation5]  }
  0x16   :  { %v40_v6 = vrot.slane %v39_v4, 4  ;;  %s65_s20 = sshll.u32 %s131_s0, 4  ;;  %s66_s20 = int_to_ptr.vmem [resolvable:$true] %s65_s20 }
  0x17   :  { %v34_v7 = vadd.f32 %v33_v5, %v32_v3  ;;  %s101_s21 = scalar_lea.vmem %s66_s20, 32  ;;  %p106_p9 = scmp.lt.s32.totalorder %s66_s20, %s66_s20 }
  0x18   :  { %v41_v8 = vadd.f32 %v40_v6, %v39_v4  ;;  %p102_p8 = scmp.ne.s32.totalorder %s66_s20, %s101_s21  ;;  %p107_p10 = scmp.lt.s32.totalorder %s101_s21, %s101_s21 }
  0x19   :  { %v35_v9 = vrot.slane %v34_v7, 2 }
  0x1a   :  { %v42_v10 = vrot.slane %v41_v8, 2  ;;  %p108_p11 = por %p107_p10, %p106_p9 }
  0x1b   :  { %v36_v11 = vadd.f32 %v35_v9, %v34_v7  ;;  %v28_v15 = vld [vmem:[#allocation5] sm:$0x3] }
  0x1c   :  { %v43_v12 = vadd.f32 %v42_v10, %v41_v8  ;;  %p109_p12 = pnand %p108_p11, %p102_p8 }
  0x1d   :  { %v37_v13 = vrot.slane %v36_v11, 1 }
  0x1e   :  { %v44_v14 = vrot.slane %v43_v12, 1 }
  0x1f   :  { %v38_v16 = vadd.f32 %v37_v13, %v36_v11 }
  0x20   :  { %v45_v17 = vadd.f32 %v44_v14, %v43_v12 }
  0x22   :  { %v49_v18 = vsel %vm48_vm1, %v45_v17, %v38_v16 }
  0x23   :  { %v51_v19 = vadd.f32 %v49_v18, %v28_v15 }
  0x25   :  { %52 = vst [vmem:[#allocation5] sm:$0x3] %v51_v19 }
  0x2c   :  { %v56_v20 = vld [vmem:[#allocation5] sm:$0x3] }
  0x2d   :  { %v57_v21 = vmul.f32 0.125, %v56_v20 }
  0x2f   :  { %58 = vst [vmem:[#allocation5] sm:$0x3] %v57_v21 }
  0x30   :  { %112 = shalt.err (!%p109_p12)
}
  0x31   :  { %s113_s24 = scalar_lea.hbm %s167_s1, 32 }
  0x32   :  { %p114_p13 = scmp.ne.s32.totalorder %s167_s1, %s113_s24  ;;  %p117_p0 = scmp.lt.u32.totalorder %s113_s24, %s167_s1 }
  0x34   :  { %p119_p1 = pnand %p117_p0, %p114_p13 }
  0x36   :  { %122 = shalt.err (!%p119_p1)
}
  0x37   :  { %68 = dma.vmem_to_hbm [thread:$0]  %s66_s20, 32, %s167_s1, [#allocation4]  }
  0x38   :  { %125 = dma.done.wait [#allocation4], 32  }
  0x39   :  { %126 = vsyncadd [#allocation4], 4294967264 }
  0x3a   :  { %72 = vsyncpa [#allocation3], 1 }
  0x3b   :  { %73 = vsyncpa [#allocation4], 1 }

</bundles_post_ra>
